<compile_context>
chip_gen: v7x
topology: tpu7x:2x2x1
jax: 0.10.0
libtpu: 0.0.40
codegen_flags: <defaults>
</compile_context>

<pallas_src>
import functools

import jax
import jax.numpy as jnp
from jax.experimental import pallas as pl
from jax.experimental.pallas import tpu as pltpu


def _round_up(x, m):
    return ((x + m - 1) // m) * m


def _weight_spec_kwargs():
    """Single-buffer kwargs for grid-invariant operands, if supported."""
    buffered = getattr(pl, "Buffered", None)
    if buffered is None:
        return {}
    try:
        pl.BlockSpec((8, 128), lambda i: (0, 0), pipeline_mode=buffered(1))
    except TypeError:
        return {}
    return {"pipeline_mode": buffered(1)}


_WEIGHT_SPEC_KW = _weight_spec_kwargs()


def _physical_vmem_bytes():
    try:
        info = pltpu.get_tpu_info()
        return int(getattr(info, "vmem_capacity_bytes", 64 << 20))
    except Exception:
        return 64 << 20  # conservative: v7x per-TensorCore VMEM


# --------------------------------------------------------------------------- #
# Kernel
# --------------------------------------------------------------------------- #
def _fused_kernel(x_ref, w1_ref, b1_ref, w2_ref, b2_ref, loc_ref, scale_ref,
                  *, nl_pad):
    """One batch tile of x; bf16 weights resident in VMEM."""
    # Cast to bf16 inside the kernel: saves a standalone HBM convert pass.
    x = x_ref[...].astype(jnp.bfloat16)

    # Layer 1: bf16 x bf16 -> f32 accumulate on the MXU; ReLU in f32.
    h = jnp.dot(x, w1_ref[...], preferred_element_type=jnp.float32) + b1_ref[...]
    h = jnp.maximum(h, 0.0)

    # Layer 2: fused, 128-lane-aligned [W_loc | W_scale] -> one wide matmul.
    z = jnp.dot(h.astype(jnp.bfloat16), w2_ref[...],
                preferred_element_type=jnp.float32) + b2_ref[...]

    # Halves are 128-lane aligned -> slicing is layout-free; softplus only on
    # the scale half.  softplus(z) = max(z,0) + log1p(exp(-|z|)).
    z_loc = z[:, :nl_pad]
    z_scale = z[:, nl_pad:]
    sp = jnp.maximum(z_scale, 0.0) + jnp.log1p(jnp.exp(-jnp.abs(z_scale)))

    loc_ref[...] = z_loc.astype(loc_ref.dtype)
    # Tiny epsilon so a downstream Normal never sees an exact-zero scale.
    scale_ref[...] = (sp + 1e-8).astype(scale_ref.dtype)


# --------------------------------------------------------------------------- #
# Parameter fusion (done once, cached) and forward wrapper
# --------------------------------------------------------------------------- #
def fuse_params(params):
    """Pre-fuse / pre-cast model params for the Pallas kernel.

    Returns (w1_bf16, b1_f32, w2_bf16, b2_f32, n_latent, nl_pad) where the
    second-layer weight is [W_loc | W_scale] with each half zero-padded to a
    multiple of 128 lanes (lane-dense stores, no masked writes).
    """
    w1, b1, wl, bl, ws, bs = params
    n_latent = wl.shape[1]
    nl_pad = _round_up(max(n_latent, 1), 128)
    pad = nl_pad - n_latent

    wl_p = jnp.pad(wl.astype(jnp.float32), ((0, 0), (0, pad)))
    ws_p = jnp.pad(ws.astype(jnp.float32), ((0, 0), (0, pad)))
    bl_p = jnp.pad(bl.astype(jnp.float32).reshape(1, -1), ((0, 0), (0, pad)))
    bs_p = jnp.pad(bs.astype(jnp.float32).reshape(1, -1), ((0, 0), (0, pad)))

    w1_bf = w1.astype(jnp.bfloat16)
    b1_f = b1.astype(jnp.float32).reshape(1, -1)
    w2_bf = jnp.concatenate([wl_p, ws_p], axis=1).astype(jnp.bfloat16)
    b2_f = jnp.concatenate([bl_p, bs_p], axis=1)
    return (w1_bf, b1_f, w2_bf, b2_f, n_latent, nl_pad)


def fused_forward(x, fused, *, tile_batch=None):
    """Run the fused Pallas kernel on pre-fused parameters."""
    w1_bf, b1_f, w2_bf, b2_f, n_latent, nl_pad = fused
    batch, n_input = x.shape
    n_hidden = w1_bf.shape[1]
    out_w = 2 * nl_pad
    x_bytes = jnp.dtype(x.dtype).itemsize

    phys_vmem = _physical_vmem_bytes()
    vmem_budget = int(phys_vmem * 0.75)  # headroom for compiler scratch
    if tile_batch is None:
        # v7x (64 MiB VMEM) -> 256-row tiles; v5e/v6e (128 MiB) -> 512.
        tile_batch = 256 if phys_vmem <= (64 << 20) else 512

    # ---- pick a batch tile that fits the VMEM budget ------------------------
    resident = ((n_input * n_hidden + n_hidden * out_w) * 2   # bf16 weights
                + (n_hidden + out_w) * 4)                     # f32 biases
    per_row = (2 * n_input * x_bytes      # x tile, double-buffered
               + 2 * 2 * nl_pad * 4       # two f32 output tiles, double-buffered
               + n_hidden * 6             # h (f32) + bf16 copy
               + out_w * 4)               # z temp
    avail = vmem_budget - resident
    tb_fit = max(8, (avail // per_row) // 8 * 8) if avail > 8 * per_row else 8
    tb = max(8, (min(int(tile_batch), tb_fit) // 8) * 8)
    # Keep >= 2 grid steps whenever possible: feeds both v7x TensorCores and
    # avoids over-padding small batches.
    if batch > 8:
        tb = min(tb, _round_up(pl.cdiv(batch, 2), 8))
    tb = max(8, tb)

    padded = _round_up(batch, tb)
    xp = x if padded == batch else jnp.pad(x, ((0, padded - batch), (0, 0)))
    grid = (padded // tb,)

    est = resident + tb * per_row
    vmem_limit = int(min(vmem_budget, max(32 << 20, int(1.5 * est))))

    cost = pl.CostEstimate(
        flops=2 * padded * (n_input * n_hidden + n_hidden * out_w),
        transcendentals=2 * padded * nl_pad,
        bytes_accessed=(padded * n_input * x_bytes
                        + (n_input * n_hidden + n_hidden * out_w) * 2
                        + (n_hidden + out_w) * 4
                        + 2 * padded * nl_pad * 4),
    )

    loc_p, scale_p = pl.pallas_call(
        functools.partial(_fused_kernel, nl_pad=nl_pad),
        out_shape=(jax.ShapeDtypeStruct((padded, nl_pad), jnp.float32),
                   jax.ShapeDtypeStruct((padded, nl_pad), jnp.float32)),
        grid_spec=pltpu.PrefetchScalarGridSpec(
            num_scalar_prefetch=0,
            grid=grid,
            in_specs=[
                pl.BlockSpec((tb, n_input), lambda i: (i, 0)),                   # x tile
                pl.BlockSpec((n_input, n_hidden), lambda i: (0, 0),
                             **_WEIGHT_SPEC_KW),                                 # W1
                pl.BlockSpec((1, n_hidden), lambda i: (0, 0),
                             **_WEIGHT_SPEC_KW),                                 # b1
                pl.BlockSpec((n_hidden, out_w), lambda i: (0, 0),
                             **_WEIGHT_SPEC_KW),                                 # [W_loc|W_scale]
                pl.BlockSpec((1, out_w), lambda i: (0, 0),
                             **_WEIGHT_SPEC_KW),                                 # [b_loc|b_scale]
            ],
            out_specs=[
                pl.BlockSpec((tb, nl_pad), lambda i: (i, 0)),                    # loc (padded)
                pl.BlockSpec((tb, nl_pad), lambda i: (i, 0)),                    # scale (padded)
            ],
        ),
        compiler_params=pltpu.CompilerParams(
            dimension_semantics=("parallel",),
            vmem_limit_bytes=vmem_limit,
        ),
        cost_estimate=cost,
    )(xp, w1_bf, b1_f, w2_bf, b2_f)

    return loc_p[:batch, :n_latent], scale_p[:batch, :n_latent]


def pyro_model_forward(x, params, *, tile_batch=None):
    """Convenience wrapper: fuse raw params on the fly, then run the kernel."""
    return fused_forward(x, fuse_params(params), tile_batch=tile_batch)


# --------------------------------------------------------------------------- #
# Module (mirrors PyroBaseModuleClass surface)
# --------------------------------------------------------------------------- #
class PyroBaseModulePallas:
    """Pallas analogue of scvi PyroBaseModuleClass.

    `forward` is a passthrough to `self.model`, exactly as in the PyTorch base
    class. The concrete model is a deterministic synthetic amortized encoder.
    """

    def __init__(self, n_input, n_hidden, n_latent, on_load_kwargs=None,
                 key=None):
        self.on_load_kwargs = on_load_kwargs or {}
        self.n_obs = None
        if key is None:
            key = jax.random.PRNGKey(0)
        k1, k2, k3 = jax.random.split(key, 3)
        scale1 = 1.0 / jnp.sqrt(n_input)
        scale2 = 1.0 / jnp.sqrt(n_hidden)
        self._params = (
            jax.random.normal(k1, (n_input, n_hidden), jnp.float32) * scale1,
            jnp.zeros((1, n_hidden), jnp.float32),
            jax.random.normal(k2, (n_hidden, n_latent), jnp.float32) * scale2,
            jnp.zeros((1, n_latent), jnp.float32),
            jax.random.normal(k3, (n_hidden, n_latent), jnp.float32) * scale2,
            jnp.zeros((1, n_latent), jnp.float32),
        )
        # Pre-fuse / pre-cast the static weights ONCE (no per-call concat /
        # astype HBM passes).
        self._fused = fuse_params(self._params)

    @property
    def list_obs_plate_vars(self):
        return {"name": "", "in": [], "sites": {}}

    @staticmethod
    def _get_fn_args_from_batch(tensor_dict):
        return (tensor_dict["X"],), {}

    @property
    def model(self):
        def _model(x):
            return fused_forward(x, self._fused)
        return _model

    @property
    def guide(self):
        # Same signature as model (Pyro convention); here it shares the network.
        return self.model

    def forward(self, *args, **kwargs):
        """Passthrough to the (Pallas) model."""
        return self.model(*args, **kwargs)

    __call__ = forward


def _reference(x, params):
    w1, b1, wl, bl, ws, bs = params
    h = jnp.maximum(x @ w1 + b1, 0.0)
    loc = h @ wl + bl
    scale = jax.nn.softplus(h @ ws + bs)
    return loc, scale


if __name__ == "__main__":
    key = jax.random.PRNGKey(0)
    kx, kp = jax.random.split(key)

    batch, n_input, n_hidden, n_latent = 16, 32, 64, 16
    x = jax.random.normal(kx, (batch, n_input), jnp.float32)

    module = PyroBaseModulePallas(n_input, n_hidden, n_latent, key=kp)

    # forward() passes through to model(), which runs the Pallas kernel.
    args, kwargs = module._get_fn_args_from_batch({"X": x})
    loc, scale = module.forward(*args, **kwargs)
    jax.block_until_ready((loc, scale))

    ref_loc, ref_scale = _reference(x, module._params)
    assert loc.shape == (batch, n_latent) and scale.shape == (batch, n_latent)
    # bf16 matmul operands -> relaxed tolerance vs the f32 reference.
    assert jnp.allclose(loc, ref_loc, atol=5e-2, rtol=5e-2)
    assert jnp.allclose(scale, ref_scale, atol=5e-2, rtol=5e-2)
    assert bool(jnp.all(scale > 0))

    # Ragged-batch / multi-step-grid path (padding + cdiv), raw params path.
    x2 = jax.random.normal(jax.random.PRNGKey(42), (50, n_input), jnp.float32)
    loc2, scale2 = pyro_model_forward(x2, module._params, tile_batch=16)
    jax.block_until_ready((loc2, scale2))
    ref_loc2, ref_scale2 = _reference(x2, module._params)
    assert loc2.shape == (50, n_latent) and scale2.shape == (50, n_latent)
    assert jnp.allclose(loc2, ref_loc2, atol=5e-2, rtol=5e-2)
    assert jnp.allclose(scale2, ref_scale2, atol=5e-2, rtol=5e-2)
    assert bool(jnp.all(scale2 > 0))

    print("KERNEL_OK")
</pallas_src>

<mosaic_0001>
module attributes {stable_mosaic.version = 11 : i64} {
  func.func @_fused_kernel(%arg0: i32, %arg1: memref<8x32xf32, #tpu.memory_space<vmem>>, %arg2: memref<32x64xbf16, #tpu.memory_space<vmem>>, %arg3: memref<1x64xf32, #tpu.memory_space<vmem>>, %arg4: memref<64x256xbf16, #tpu.memory_space<vmem>>, %arg5: memref<1x256xf32, #tpu.memory_space<vmem>>, %arg6: memref<8x128xf32, #tpu.memory_space<vmem>>, %arg7: memref<8x128xf32, #tpu.memory_space<vmem>>) attributes {dimension_semantics = [#tpu.dimension_semantics<parallel>], iteration_bounds = array<i64: 2>, scalar_prefetch = 0 : i64, scratch_operands = 0 : i64, tpu.core_type = #tpu.core_type<tc>, window_params = [{transform_indices = @transform_0, window_bounds = array<i64: 8, 32>}, {pipeline_mode = #tpu.pipeline_mode<synchronous>, transform_indices = @transform_1, window_bounds = array<i64: 32, 64>}, {pipeline_mode = #tpu.pipeline_mode<synchronous>, transform_indices = @transform_2, window_bounds = array<i64: 1, 64>}, {pipeline_mode = #tpu.pipeline_mode<synchronous>, transform_indices = @transform_3, window_bounds = array<i64: 64, 256>}, {pipeline_mode = #tpu.pipeline_mode<synchronous>, transform_indices = @transform_4, window_bounds = array<i64: 1, 256>}, {transform_indices = @transform_5, window_bounds = array<i64: 8, 128>}, {transform_indices = @transform_6, window_bounds = array<i64: 8, 128>}]} {
    %c0 = arith.constant 0 : index
    %c0_0 = arith.constant 0 : index
    %0 = vector.load %arg1[%c0, %c0_0] : memref<8x32xf32, #tpu.memory_space<vmem>>, vector<8x32xf32>
    %1 = arith.truncf %0 : vector<8x32xf32> to vector<8x32xbf16>
    %c0_1 = arith.constant 0 : index
    %c0_2 = arith.constant 0 : index
    %2 = vector.load %arg2[%c0_1, %c0_2] : memref<32x64xbf16, #tpu.memory_space<vmem>>, vector<32x64xbf16>
    %cst = arith.constant dense<0.000000e+00> : vector<8x64xf32>
    %3 = tpu.matmul %1, %2, %cst {dimension_numbers = #tpu.dot_dimension_numbers<[1], [0], [0], [1], [0, 0, 1, 1], [], []>} : vector<8x32xbf16>, vector<32x64xbf16>, vector<8x64xf32> -> vector<8x64xf32>
    %c0_3 = arith.constant 0 : index
    %c0_4 = arith.constant 0 : index
    %4 = vector.load %arg3[%c0_3, %c0_4] : memref<1x64xf32, #tpu.memory_space<vmem>>, vector<1x64xf32>
    %5 = vector.broadcast %4 : vector<1x64xf32> to vector<8x64xf32>
    %6 = arith.addf %3, %5 : vector<8x64xf32>
    %cst_5 = arith.constant 0.000000e+00 : f32
    %7 = vector.broadcast %cst_5 : f32 to vector<8x64xf32>
    %8 = arith.maximumf %6, %7 : vector<8x64xf32>
    %9 = arith.truncf %8 : vector<8x64xf32> to vector<8x64xbf16>
    %c0_6 = arith.constant 0 : index
    %c0_7 = arith.constant 0 : index
    %10 = vector.load %arg4[%c0_6, %c0_7] : memref<64x256xbf16, #tpu.memory_space<vmem>>, vector<64x256xbf16>
    %cst_8 = arith.constant dense<0.000000e+00> : vector<8x256xf32>
    %11 = tpu.matmul %9, %10, %cst_8 {dimension_numbers = #tpu.dot_dimension_numbers<[1], [0], [0], [1], [0, 0, 1, 1], [], []>} : vector<8x64xbf16>, vector<64x256xbf16>, vector<8x256xf32> -> vector<8x256xf32>
    %c0_9 = arith.constant 0 : index
    %c0_10 = arith.constant 0 : index
    %12 = vector.load %arg5[%c0_9, %c0_10] : memref<1x256xf32, #tpu.memory_space<vmem>>, vector<1x256xf32>
    %13 = vector.broadcast %12 : vector<1x256xf32> to vector<8x256xf32>
    %14 = arith.addf %11, %13 : vector<8x256xf32>
    %15 = vector.extract_strided_slice %14 {offsets = [0, 0], sizes = [8, 128], strides = [1, 1]} : vector<8x256xf32> to vector<8x128xf32>
    %16 = vector.extract_strided_slice %14 {offsets = [0, 128], sizes = [8, 128], strides = [1, 1]} : vector<8x256xf32> to vector<8x128xf32>
    %cst_11 = arith.constant 0.000000e+00 : f32
    %17 = vector.broadcast %cst_11 : f32 to vector<8x128xf32>
    %18 = arith.maximumf %16, %17 : vector<8x128xf32>
    %19 = math.absf %16 : vector<8x128xf32>
    %cst_12 = arith.constant 0.000000e+00 : f32
    %20 = vector.broadcast %cst_12 : f32 to vector<8x128xf32>
    %21 = arith.subf %20, %19 : vector<8x128xf32>
    %22 = math.exp %21 : vector<8x128xf32>
    %23 = math.log1p %22 : vector<8x128xf32>
    %24 = arith.addf %18, %23 : vector<8x128xf32>
    %c0_13 = arith.constant 0 : index
    %c0_14 = arith.constant 0 : index
    %25 = vector.load %arg6[%c0_13, %c0_14] : memref<8x128xf32, #tpu.memory_space<vmem>>, vector<8x128xf32>
    tpu.vector_store %arg6[%c0_13, %c0_14], %15 {strides = array<i32>} : memref<8x128xf32, #tpu.memory_space<vmem>>, vector<8x128xf32>,
    %cst_15 = arith.constant 9.99999993E-9 : f32
    %26 = vector.broadcast %cst_15 : f32 to vector<8x128xf32>
    %27 = arith.addf %24, %26 : vector<8x128xf32>
    %c0_16 = arith.constant 0 : index
    %c0_17 = arith.constant 0 : index
    %28 = vector.load %arg7[%c0_16, %c0_17] : memref<8x128xf32, #tpu.memory_space<vmem>>, vector<8x128xf32>
    tpu.vector_store %arg7[%c0_16, %c0_17], %27 {strides = array<i32>} : memref<8x128xf32, #tpu.memory_space<vmem>>, vector<8x128xf32>,
    return
  }
  func.func @transform_0(%arg0: i32) -> (i32, i32) {
    %c0_i32 = arith.constant 0 : i32
    %c0_i32_0 = arith.constant 0 : i32
    return %arg0, %c0_i32 : i32, i32
  }
  func.func @transform_1(%arg0: i32) -> (i32, i32) {
    %c0_i32 = arith.constant 0 : i32
    %c0_i32_0 = arith.constant 0 : i32
    %c0_i32_1 = arith.constant 0 : i32
    return %c0_i32, %c0_i32_0 : i32, i32
  }
  func.func @transform_2(%arg0: i32) -> (i32, i32) {
    %c0_i32 = arith.constant 0 : i32
    %c0_i32_0 = arith.constant 0 : i32
    %c0_i32_1 = arith.constant 0 : i32
    return %c0_i32, %c0_i32_0 : i32, i32
  }
  func.func @transform_3(%arg0: i32) -> (i32, i32) {
    %c0_i32 = arith.constant 0 : i32
    %c0_i32_0 = arith.constant 0 : i32
    %c0_i32_1 = arith.constant 0 : i32
    return %c0_i32, %c0_i32_0 : i32, i32
  }
  func.func @transform_4(%arg0: i32) -> (i32, i32) {
    %c0_i32 = arith.constant 0 : i32
    %c0_i32_0 = arith.constant 0 : i32
    %c0_i32_1 = arith.constant 0 : i32
    return %c0_i32, %c0_i32_0 : i32, i32
  }
  func.func @transform_5(%arg0: i32) -> (i32, i32) {
    %c0_i32 = arith.constant 0 : i32
    %c0_i32_0 = arith.constant 0 : i32
    return %arg0, %c0_i32 : i32, i32
  }
  func.func @transform_6(%arg0: i32) -> (i32, i32) {
    %c0_i32 = arith.constant 0 : i32
    %c0_i32_0 = arith.constant 0 : i32
    return %arg0, %c0_i32 : i32, i32
  }
}

</mosaic_0001>

<bundles_post_ra>
// kernel: tpu_custom_call.1
= control target key start
LH: loop header
LB: loop body
LE: loop exit
PB: predicated region body
PF: predicated region fallthrough
CT: control target
= control target key end

     0   :  { %12 = vsyncpa [#allocation3], 0  ;;  %s1305_s0 = inlined_call_operand.hbm [shape: f32[16,32], index: 0, kind: input, shape index: {}]   ;;  %s1306_s1 = inlined_call_operand.hbm [shape: bf16[32,64], index: 1, kind: input, shape index: {}]   ;;  %s1307_s2 = inlined_call_operand.vmem [shape: f32[1,64], index: 2, kind: input, shape index: {}]   ;;  %s1308_s3 = inlined_call_operand.hbm [shape: bf16[64,256], index: 3, kind: input, shape index: {}]   ;;  %s1309_s4 = inlined_call_operand.vmem [shape: f32[1,256], index: 4, kind: input, shape index: {}]   ;;  %s1310_s5 = inlined_call_operand.hbm [shape: f32[16,128], index: 5, kind: output, shape index: {0}]   ;;  %s1311_s6 = inlined_call_operand.hbm [shape: f32[16,128], index: 6, kind: output, shape index: {1}]  }
   0x1   :  { %14 = vsyncpa [#allocation3 + $0x1], 0 }
   0x2   :  { %15 = vsyncpa [#allocation6], 0 }
   0x3   :  { %16 = vsyncpa [#allocation4], 0 }
   0x4   :  { %18 = vsyncpa [#allocation4 + $0x1], 0 }
   0x5   :  { %19 = vsyncpa [#allocation10], 0 }
   0x6   :  { %21 = vsyncpa [#allocation10 + $0x1], 0  ;;  %s1032_s21 = smov 0   ;;  %s1034_s22 = smov 0  }
   0x7   :  { %s1036_s23 = smov 0   ;;  %s1038_s24 = smov 0  }
   0x8 LB: > { %s1053_s25 = sadd.s32 4294967295, %s983_s24   ;;  %s655_s26 = sadd.s32 4294967294, %s983_s24   ;;  %s983_s24 = sphi %s1038_s24, %s1331_s24   ;;  %s979_s23 = sphi %s1036_s23, %s1330_s23   ;;  %s975_s22 = sphi %s1034_s22, %s1329_s22   ;;  %s971_s21 = sphi %s1032_s21, %s1328_s21  }
   0x9   : > { %p47_p0 = scmp.ne.s32.totalorder %s975_s22, %s971_s21  ;;  %p1312_p1 = scmp.eq.s32.totalorder %s1053_s25, 0 }
   0xa   : > { %p161_p3 = scmp.eq.s32.totalorder %s655_s26, 1  ;;  %p656_p5 = scmp.ge.s32.totalorder %s983_s24, 1 }
   0xb   : > { %p1062_p4 = por %p1312_p1, %p47_p0  ;;  %p194_p7 = scmp.lt.s32.totalorder %s983_s24, 3 }
   0xc   : > { %p1067_p6 = por %p161_p3, %p47_p0  ;;  %s985_s30 = smov [#allocation5]  }
   0xd   : > { %s1315_s27 = scalar_select %p1062_p4, 1, 0 }
   0xe   : > { %s1316_s28 = scalar_select %p1067_p6, 1, 0 }
   0xf   : > { %p1072_p8 = pnand %p656_p5, %p194_p7  ;;  %s206_s7 = sshll.u32 %s985_s30, 4  ;;  %s1076_s7 = int_to_ptr.vmem [resolvable:$true] %s206_s7 }
  0x10   : > { %s986_s9 = smov [#allocation7]   ;;  %s795_s13 = scalar_lea.hbm %s1306_s1, 256 }
  0x11   : > { %p712_p9 = pneg %p1072_p8  ;;  %s222_s10 = sshll.u32 %s986_s9, 4  ;;  %s1087_s10 = int_to_ptr.vmem [resolvable:$true] %s222_s10 }
  0x12   : > { %p796_p12 = scmp.ne.s32.totalorder %s1306_s1, %s795_s13  ;;  %p802_p5 = scmp.lt.u32.totalorder %s795_s13, %s1306_s1 }
  0x13   : > { %p1083_p11 = pnand %p712_p9, %p1312_p1 }
  0x15   : > { %p797_p13 = pneg %p1083_p11 }
  0x17   : > { %p798_p0 = pnand %p797_p13, %p796_p12 }
  0x19   : > { %p799_p3 = pneg %p798_p0 }
  0x1b   : > { %p804_p7 = pnand %p802_p5, %p799_p3 }
  0x1d   : > { %807 = shalt.err (!%p804_p7)
}
  0x1e   : > { %s808_s18 = scalar_lea.vmem %s1076_s7, 256  ;;  %p816_p2 = scmp.lt.s32.totalorder %s1076_s7, %s1076_s7 }
  0x1f   : > { %p809_p9 = scmp.ne.s32.totalorder %s1076_s7, %s808_s18  ;;  %p817_p12 = scmp.lt.s32.totalorder %s808_s18, %s808_s18 }
  0x21   : > { %p811_p10 = pnand %p809_p9, %p797_p13  ;;  %p818_p0 = por %p817_p12, %p816_p2 }
  0x23   : > { %p812_p1 = pneg %p811_p10 }
  0x25   : > { %p819_p6 = pnand %p818_p0, %p812_p1 }
  0x27   : > { %822 = shalt.err (!%p819_p6)
}
  0x28   : > { %s987_s19 = smov 64   ;;  %s988_s20 = smov 4  }
  0x29   : > { %715 = dma.hbm_to_vmem [thread:$0]  (!%p1083_p11), %s1306_s1, 256, %s1076_s7, [#allocation6], %s987_s19, %s987_s19, %s988_s20  }
  0x2a   : > { %s823_s12 = scalar_lea.hbm %s1308_s3, 1024 }
  0x2b   : > { %p824_p2 = scmp.ne.s32.totalorder %s1308_s3, %s823_s12  ;;  %p830_p10 = scmp.lt.u32.totalorder %s823_s12, %s1308_s3 }
  0x2d   : > { %p826_p1 = pnand %p824_p2, %p797_p13 }
  0x2f   : > { %p827_p6 = pneg %p826_p1 }
  0x31   : > { %p832_p3 = pnand %p830_p10, %p827_p6 }
  0x33   : > { %835 = shalt.err (!%p832_p3)
}
  0x34   : > { %s836_s7 = scalar_lea.vmem %s1087_s10, 1024  ;;  %p844_p12 = scmp.lt.s32.totalorder %s1087_s10, %s1087_s10 }
  0x35   : > { %p837_p5 = scmp.ne.s32.totalorder %s1087_s10, %s836_s7  ;;  %p845_p0 = scmp.lt.s32.totalorder %s836_s7, %s836_s7 }
  0x37   : > { %p839_p7 = pnand %p837_p5, %p797_p13  ;;  %p846_p2 = por %p845_p0, %p844_p12 }
  0x39   : > { %p840_p9 = pneg %p839_p7 }
  0x3b   : > { %p847_p1 = pnand %p846_p2, %p840_p9 }
  0x3d   : > { %850 = shalt.err (!%p847_p1)
}
  0x3e   : > { %s989_s17 = smov 128   ;;  %s990_s18 = smov 8  }
  0x3f   : > { %718 = dma.hbm_to_vmem [thread:$0]  (!%p1083_p11), %s1308_s3, 1024, %s1087_s10, [#allocation6], %s989_s17, %s989_s17, %s990_s18  }
  0x40   : > { %s1142_s26 = sadd.s32 1, %s983_s24   ;;  %s34_s9 = sadd.s32 1, %s979_s23 }
  0x41   : > { %s31_s30 = ssub.s32 %s983_s24, %s1142_s26  ;;  %p41_p6 = scmp.ne.s32.totalorder %s979_s23, %s975_s22 }
  0x42   : > { %p32_p13 = scmp.eq.s32.totalorder %s31_s30, 0  ;;  %p42_p10 = scmp.eq.s32.totalorder %s983_s24, 0 }
  0x43   : > { %p1319_p5 = scmp.eq.s32.totalorder %s1053_s25, 1  ;;  %p732_p9 = scmp.lt.s32.totalorder %s983_s24, 2 }
  0x44   : > { %s1151_s11 = scalar_select %p32_p13, %s979_s23, %s34_s9  }
  0x45   : > { %p43_p3 = por %p42_p10, %p41_p6  ;;  %p1155_p7 = por %p1319_p5, %p41_p6 }
  0x46   : > { %s239_s8 = sand.u32 1, %s979_s23   ;;  %s661_s10 = sshll.u32 %s983_s24, 7 }
  0x47   : > { %s1320_s12 = scalar_select %p1155_p7, 1, 0 }
  0x48   : > { %s660_s13 = sshll.u32 %s239_s8, 3  ;;  %s1165_s16 = scalar_lea.hbm %s1305_s0, %s661_s10 }
  0x49   : > { %s243_s7 = scalar_lea.vmem [#allocation2], %s660_s13  ;;  %p1169_p11 = pnand %p732_p9, %p43_p3 }
  0x4a   : > { %s250_s17 = sshll.u32 %s243_s7, 4  ;;  %s240_s19 = scalar_lea.sflag [#allocation3], %s239_s8  ;;  %s1167_s17 = int_to_ptr.vmem [resolvable:$true] %s250_s17 }
  0x4b   : > { %s851_s20 = scalar_lea.hbm %s1165_s16, 128  ;;  %p853_p0 = pneg %p1169_p11 }
  0x4c   : > { %p852_p12 = scmp.ne.s32.totalorder %s1165_s16, %s851_s20  ;;  %s856_s13 = scalar_lea.hbm %s1305_s0, 256 }
  0x4d   : > { %p857_p13 = scmp.lt.u32.totalorder %s1165_s16, %s1305_s0  ;;  %p858_p6 = scmp.lt.u32.totalorder %s856_s13, %s851_s20 }
  0x4e   : > { %p854_p2 = pnand %p853_p0, %p852_p12  ;;  %p860_p3 = scmp.lt.u32.totalorder %s851_s20, %s1165_s16 }
  0x4f   : > { %p859_p10 = por %p858_p6, %p857_p13 }
  0x50   : > { %p855_p1 = pneg %p854_p2 }
  0x51   : > { %p861_p5 = por %p860_p3, %p859_p10 }
  0x53   : > { %p862_p9 = pnand %p861_p5, %p855_p1 }
  0x55   : > { %865 = shalt.err (!%p862_p9)
}
  0x56   : > { %s866_s8 = scalar_lea.vmem %s1167_s17, 128  ;;  %s991_s15 = smov [#allocation2]  }
  0x57   : > { %p867_p12 = scmp.ne.s32.totalorder %s1167_s17, %s866_s8  ;;  %s871_s7 = sshll.u32 %s991_s15, 4  ;;  %s872_s7 = int_to_ptr.vmem [resolvable:$false] %s871_s7 }
  0x58   : > { %s873_s30 = scalar_lea.vmem %s872_s7, 256  ;;  %p874_p4 = scmp.lt.s32.totalorder %s1167_s17, %s872_s7 }
  0x59   : > { %p869_p2 = pnand %p867_p12, %p853_p0  ;;  %p875_p13 = scmp.lt.s32.totalorder %s873_s30, %s866_s8 }
  0x5b   : > { %p870_p7 = pneg %p869_p2  ;;  %p876_p6 = por %p875_p13, %p874_p4 }
  0x5d   : > { %p877_p10 = pnand %p876_p6, %p870_p7 }
  0x5f   : > { %880 = shalt.err (!%p877_p10)
}
  0x60   : > { %722 = dma.hbm_to_vmem [thread:$0]  (!%p1169_p11), %s1165_s16, 128, %s1167_s17, %s240_s19  }
  0x61   : > { %259 = sbr.rel (%p1072_p8) target bundleno = 612 (0x264), region = 40  ;;  %s1201_s20 = sand.u32 (!%p1072_p8), 1, %s975_s22  }
  0x62   : > { %s1204_s9 = sshll.u32 (!%p1072_p8), %s1201_s20, 3  ;;  %s262_s13 = scalar_lea.sflag (!%p1072_p8), [#allocation3], %s1201_s20 }
  0x63   : > { %s265_s10 = scalar_lea.vmem (!%p1072_p8), [#allocation2], %s1204_s9  ;;  %p1322_p4 = scmp.ne.s32.totalorder (!%p1072_p8), %s1315_s27, 0 }
  0x68   : > { %954 = dma.done.wait (%p1322_p4), %s262_s13, 128  }
  0x69   : > { %956 = vsyncadd (%p1322_p4), %s262_s13, 4294967168  ;;  %p1323_p7 = scmp.eq.s32.totalorder %s1053_s25, 0 }
  0x6b   : > { %958 = dma.done.wait (%p1323_p7), [#allocation6], 1280   ;;  %p1324_p8 = pmov %p1323_p7 }
  0x6c   : > { %v992_v0 = vmov 0.0   ;;  %vm993_vm0 = vmmov 0   ;;  %v777_v1 = vld [vmem:[#allocation5] sm:$0xff]   ;;  %v778_v2 = vld [vmem:[#allocation5 + $0x8] sm:$0xff]   ;;  %v308_v3 = vld [vmem:[%s265_s10] sm:$0xff]  ;;  %vm333_vm1 = vcmask 261120   ;;  %v389_v22 = vlaneseq }
  0x6d   : > { %960 = vsyncadd (%p1324_p8), [#allocation6], 4294966016  ;;  %690 = vmatprep.subr.bf16.mxu0 %v992_v0  ;;  %694 = vmatprep.mubr.msk.bf16.mxu0 %vm993_vm0, %v992_v0  ;;  %v779_v4 = vld [vmem:[#allocation7 + $0x4] ss:$8 sps:$4 sm:$0xff]   ;;  %v781_v5 = vld [vmem:[#allocation7] ss:$8 sps:$4 sm:$0xff]   ;;  %v309_v7 = vpack.c.bf16 %v308_v3, %v308_v3 }
  0x6e   : > { %691 = vmatpush3.bf16.msra.mxu0 %v777_v1  ;;  %v782_v6 = vld [vmem:[#allocation7 + $0x14] ss:$8 sps:$4 sm:$0xff]   ;;  %443 = vmatprep.subr.bf16.mxu1 %v779_v4  ;;  %v784_v8 = vld [vmem:[#allocation7 + $0x10] ss:$8 sps:$4 sm:$0xff]   ;;  %v785_v9 = vld [vmem:[#allocation7 + $0x24] ss:$8 sps:$4 sm:$0xff]  }
  0x6f   : > { %692 = vmatprep.subr.bf16.mxu0 %v992_v0  ;;  %444 = vmatpush1.bf16.msra.mxu1 %v781_v5  ;;  %v787_v10 = vld [vmem:[#allocation7 + $0x20] ss:$8 sps:$4 sm:$0xff]   ;;  %v788_v11 = vld [vmem:[#allocation7 + $0x34] ss:$8 sps:$4 sm:$0xff]   ;;  %v790_v12 = vld [vmem:[#allocation7 + $0x30] ss:$8 sps:$4 sm:$0xff]  }
  0x70   : > { %445 = vmatprep.subr.bf16.mxu1 %v782_v6  ;;  %v994_v13 = vmov 0   ;;  %v668_v14 = vld [vmem:[%s1307_s2] ss:$0 sm:$0xff]  ;;  %vm439_vm2 = vcmask 523264   ;;  %v390_v23 = vshrl.u32 %v389_v22, 7  ;;  %s683_s18 = sshll.u32 %s1053_s25, 7 }
  0x71   : > { %475 = vmatprep.mubr.bf16.mxu1 %v994_v13  ;;  %v387_v25 = vld [vmem:[%s1309_s4] sm:$0x3]  ;;  %s299_s19 = scalar_lea.vmem [#allocation8], %s1204_s9  ;;  %s1229_s7 = scalar_lea.hbm %s1310_s5, %s683_s18 }
  0x72   : > { %693 = vmatpush3.bf16.msra.mxu0 %v778_v2  ;;  %v391_v24 = vsub.s32 0, %v390_v23  ;;  %v395_v26 = vsub.s32 1, %v390_v23  ;;  %s521_s14 = sshll.u32 %s299_s19, 4  ;;  %s503_s30 = scalar_lea.sflag [#allocation4], %s1201_s20  ;;  %s1231_s14 = int_to_ptr.vmem [resolvable:$true] %s521_s14 }
  0x73   : > { %446 = vmatpush1.bf16.msra.mxu1 %v784_v8  ;;  %s881_s13 = scalar_lea.vmem %s1231_s14, 128  ;;  %p1325_p0 = scmp.ne.s32.totalorder %s1320_s12, 0 }
  0x74   : > { %447 = vmatprep.subr.bf16.mxu1 %v785_v9  ;;  %v392_v27 = vrot.slane %v387_v25, %v391_v24  ;;  %v396_v28 = vrot.slane %v387_v25, %v395_v26  ;;  %p882_p11 = scmp.ne.s32.totalorder %s1231_s14, %s881_s13  ;;  %s995_s10 = smov [#allocation8]  }
  0x75   : > { %695 = vmatmul.mubr.msk.bf16.vlgmr.msra.gmra.mrb[0].mxu0 %vm333_vm1, %v309_v7  ;;  %s885_s27 = sshll.u32 %s995_s10, 4  ;;  %s886_s27 = int_to_ptr.vmem [resolvable:$false] %s885_s27 }
  0x76   : > { %p883_p1 = pnand %p882_p11, %p1325_p0  ;;  %s887_s29 = scalar_lea.vmem %s886_s27, 256 }
  0x77   : > { %448 = vmatpush1.bf16.msra.mxu1 %v787_v10  ;;  %p888_p5 = scmp.lt.s32.totalorder %s1231_s14, %s886_s27  ;;  %p889_p9 = scmp.lt.s32.totalorder %s887_s29, %s881_s13 }
  0x78   : > { %449 = vmatprep.subr.bf16.mxu1 %v788_v11  ;;  %p884_p3 = pneg %p883_p1 }
  0x79   : > { %p890_p12 = por %p889_p9, %p888_p5 }
  0x7b   : > { %450 = vmatpush1.bf16.msra.mxu1 %v790_v12  ;;  %p891_p2 = pnand %p890_p12, %p884_p3 }
 0x148   : > { %v371_v15 = vpop.f32.mrb[0].mxu0 }
 0x149   : > { %v372_v16 = vadd.f32 %v668_v14, %v371_v15  ;;  %v696_v17 = vpop.f32.mrb[1].mxu0 }
 0x14a   : > { %v374_v18 = vpop.f32.mrb[2].mxu0 }
 0x14b   : > { %v377_v19 = vmax.f32 %v372_v16, 0.0  ;;  %v697_v20 = vpop.f32.mrb[3].mxu0 }
 0x14d   : > { %v378_v21 = vpack.c.bf16 %v377_v19, %v377_v19 }
 0x14f   : > { %680 = vmatmul.mubr.msk.bf16.vlgmr.msra.gmra.mrb[0].mxu1 %vm439_vm2, %v378_v21 }
 0x222   : > { %v477_v29 = vpop.f32.mrb[0].mxu1 }
 0x223   : > { %v478_v30 = vadd.f32 %v477_v29, %v392_v27  ;;  %v479_v31 = vpop.f32.mrb[1].mxu1 }
 0x224   : > { %v480_v32 = vadd.f32 %v479_v31, %v396_v28  ;;  %v481_v33 = vpop.f32.mrb[2].mxu1 }
 0x225   : > { %499 = vst [vmem:[%s299_s19] sm:$0xff] %v478_v30  ;;  %v482_v34 = vpop.f32.mrb[3].mxu1 }
 0x226   : > { %v485_v35 = vand.u32 2147483647, %v480_v32 }
 0x227   : > { %894 = shalt.err (!%p891_p2)
}
 0x228   : > { %s895_s16 = scalar_lea.hbm %s1229_s7, 128  ;;  %s899_s8 = scalar_lea.hbm %s1310_s5, 256 }
 0x229   : > { %p896_p13 = scmp.ne.s32.totalorder %s1229_s7, %s895_s16  ;;  %p900_p4 = scmp.lt.u32.totalorder %s1229_s7, %s1310_s5 }
 0x22a   : > { %p901_p7 = scmp.lt.u32.totalorder %s899_s8, %s895_s16  ;;  %p903_p11 = scmp.lt.u32.totalorder %s895_s16, %s1229_s7 }
 0x22b   : > { %p897_p6 = pnand %p896_p13, %p1325_p0 }
 0x22c   : > { %p902_p8 = por %p901_p7, %p900_p4 }
 0x22d   : > { %p898_p10 = pneg %p897_p6 }
 0x22e   : > { %p904_p1 = por %p903_p11, %p902_p8 }
 0x230   : > { %p905_p3 = pnand %p904_p1, %p898_p10 }
 0x232   : > { %908 = shalt.err (!%p905_p3)
}
 0x233   : > { %708 = dma.vmem_to_hbm [thread:$0]  (%p1325_p0), %s1231_s14, 128, %s1229_s7, %s503_s30   ;;  %v486_v36 = vsub.f32 0.0, %v485_v35  ;;  %v484_v46 = vmax.f32 %v480_v32, 0.0 }
 0x234   : > { %s306_s14 = scalar_lea.vmem [#allocation9], %s1204_s9  ;;  %s1261_s27 = scalar_lea.hbm %s1311_s6, %s683_s18 }
 0x235   : > { %v487_v37 = vmul.f32 1.442695, %v486_v36  ;;  %s534_s7 = sshll.u32 %s306_s14, 4  ;;  %s508_s29 = scalar_lea.sflag [#allocation10], %s1201_s20  ;;  %s1263_s7 = int_to_ptr.vmem [resolvable:$true] %s534_s7 }
 0x236   : > { %s909_s16 = scalar_lea.vmem %s1263_s7, 128  ;;  %s996_s9 = smov [#allocation9]  }
 0x237   : > { %791 = vpow2.f32 %v487_v37  ;;  %p910_p5 = scmp.ne.s32.totalorder %s1263_s7, %s909_s16  ;;  %s913_s17 = sshll.u32 %s996_s9, 4  ;;  %s914_s17 = int_to_ptr.vmem [resolvable:$false] %s913_s17 }
 0x238   : > { %s915_s25 = scalar_lea.vmem %s914_s17, 256  ;;  %p916_p2 = scmp.lt.s32.totalorder %s1263_s7, %s914_s17 }
 0x239   : > { %p911_p9 = pnand %p910_p5, %p1325_p0  ;;  %p917_p13 = scmp.lt.s32.totalorder %s915_s25, %s909_s16 }
 0x23b   : > { %p912_p12 = pneg %p911_p9  ;;  %p918_p6 = por %p917_p13, %p916_p2 }
 0x23d   : > { %p919_p10 = pnand %p918_p6, %p912_p12 }
 0x241   : > { %v792_v38 = vpop.eup %791 }
 0x242   : > { %v489_v39 = vadd.f32 1.0, %v792_v38  ;;  %v492_v40 = vmul.f32 -0.5, %v792_v38  ;;  %v495_v42 = vand.u32 2147483647, %v792_v38 }
 0x244   : > { %793 = vlog2.f32 %v489_v39  ;;  %v493_v41 = vadd.f32 1.0, %v492_v40  ;;  %vm496_vm3 = vcmp.lt.f32.partialorder %v495_v42, 0.0004427343 }
 0x246   : > { %v494_v45 = vmul.f32 %v792_v38, %v493_v41 }
 0x24e   : > { %v794_v43 = vpop.eup %793 }
 0x24f   : > { %v491_v44 = vmul.f32 0.6931472, %v794_v43 }
 0x251   : > { %v497_v47 = vsel %vm496_vm3, %v494_v45, %v491_v44 }
 0x252   : > { %v498_v48 = vadd.f32 %v497_v47, %v484_v46 }
 0x254   : > { %v500_v49 = vadd.f32 1e-08, %v498_v48 }
 0x256   : > { %501 = vst [vmem:[%s306_s14] sm:$0xff] %v500_v49 }
 0x257   : > { %922 = shalt.err (!%p919_p10)
}
 0x258   : > { %s923_s20 = scalar_lea.hbm %s1261_s27, 128  ;;  %s927_s8 = scalar_lea.hbm %s1311_s6, 256 }
 0x259   : > { %p924_p4 = scmp.ne.s32.totalorder %s1261_s27, %s923_s20  ;;  %p928_p11 = scmp.lt.u32.totalorder %s1261_s27, %s1311_s6 }
 0x25a   : > { %p929_p1 = scmp.lt.u32.totalorder %s927_s8, %s923_s20  ;;  %p931_p5 = scmp.lt.u32.totalorder %s923_s20, %s1261_s27 }
 0x25b   : > { %p925_p7 = pnand %p924_p4, %p1325_p0 }
 0x25c   : > { %p930_p3 = por %p929_p1, %p928_p11 }
 0x25d   : > { %p926_p8 = pneg %p925_p7 }
 0x25e   : > { %p932_p9 = por %p931_p5, %p930_p3 }
 0x260   : > { %p933_p12 = pnand %p932_p9, %p926_p8 }
 0x262   : > { %936 = shalt.err (!%p933_p12)
}
 0x263   : > { %709 = dma.vmem_to_hbm [thread:$0]  (%p1325_p0), %s1263_s7, 128, %s1261_s27, %s508_s29  }
 0x264 PF: > { %s546_s14 = sand.u32 1, %s971_s21   ;;  %p1326_p2 = scmp.ne.s32.totalorder %s1316_s28, 0 }
 0x265   : > { %p1327_p13 = scmp.ge.s32.totalorder %s983_s24, 2  ;;  %s547_s30 = scalar_lea.sflag [#allocation4], %s546_s14 }
 0x267   : > { %p724_p6 = pnand %p1327_p13, %p1326_p2 }
 0x269   : > { %962 = dma.done.wait (!%p724_p6), %s547_s30, 128  }
 0x26a   : > { %964 = vsyncadd (!%p724_p6), %s547_s30, 4294967168  ;;  %s556_s13 = scalar_lea.sflag [#allocation10], %s546_s14 }
 0x26b   : > { %966 = dma.done.wait (!%p724_p6), %s556_s13, 128  }
 0x26c   : > { %968 = vsyncadd (!%p724_p6), %s556_s13, 4294967168  ;;  %p24_p0 = scmp.ge.s32.totalorder %s1142_s26, 4   ;;  %s1328_s21 = smov %s975_s22 }
 0x26d   : > { %s1329_s22 = smov %s979_s23  ;;  %s1330_s23 = smov %s1151_s11 }
 0x26e   : > { %s1331_s24 = smov %s1142_s26  ;;  %26 = sbr.rel (!%p24_p0) target bundleno = 8 (0x8), region = 110 }
 0x275   :  { %561 = vsyncpa [#allocation3], 1 }
 0x276   :  { %563 = vsyncpa [#allocation3 + $0x1], 1 }
 0x277   :  { %564 = vsyncpa [#allocation6], 1 }
 0x278   :  { %565 = vsyncpa [#allocation4], 1 }
 0x279   :  { %567 = vsyncpa [#allocation4 + $0x1], 1 }
 0x27a   :  { %568 = vsyncpa [#allocation10], 1 }
 0x27b   :  { %570 = vsyncpa [#allocation10 + $0x1], 1 }

</bundles_post_ra>
